<compile_context>
chip_gen: v7x
topology: tpu7x:2x2x1
jax: 0.10.0
libtpu: 0.0.40
codegen_flags: <defaults>
</compile_context>

<pallas_src>
import functools

import jax
import jax.numpy as jnp
from jax.experimental import pallas as pl
from jax.experimental.pallas import tpu as pltpu


def _round_up(x, m):
    return (x + m - 1) // m * m


def _make_corr2d_kernel(tm, kh, kw, w_pad):
    rows = tm + kh - 1  # input rows needed per output-row tile (halo = kh-1)

    def kernel(x_hbm, k_ref, b_ref, o_ref, xbuf, sem):
        t = pl.program_id(0)
        nt = pl.num_programs(0)
        slot = t & 1

        def start_fetch(step, buf_slot):
            row0 = pl.multiple_of(step * tm, 8)
            pltpu.make_async_copy(
                x_hbm.at[pl.ds(row0, rows), :],
                xbuf.at[buf_slot],
                sem.at[buf_slot],
            ).start()

        # Prime the pipeline on the first grid step.
        @pl.when(t == 0)
        def _():
            start_fetch(t, slot)

        # Wait for this tile's input rows.
        pltpu.make_async_copy(
            x_hbm.at[pl.ds(0, rows), :], xbuf.at[slot], sem.at[slot]
        ).wait()

        # Prefetch the next tile's rows while computing on the current one.
        @pl.when(t + 1 < nt)
        def _():
            start_fetch(t + 1, 1 - slot)

        x_tile = xbuf[slot]  # (rows, w_pad) f32

        # Accumulator starts at the bias (saves a full-tile add at the end).
        acc = jnp.full((tm, w_pad), b_ref[0], dtype=jnp.float32)

        # KH row bands, each reused for KW column taps. Column shifts are lane
        # rolls (XLU slot) instead of lane-misaligned shifted loads; weight taps
        # are SMEM scalar reads.
        for i in range(kh):
            band = x_tile[i:i + tm, :]
            for j in range(kw):
                if j == 0:
                    shifted = band
                else:
                    # roll by (w_pad - j) == roll by -j: result[c] = band[c + j]
                    shifted = pltpu.roll(band, shift=w_pad - j, axis=1)
                acc = acc + shifted * k_ref[i, j]

        o_ref[...] = acc

    return kernel


@functools.partial(jax.jit, static_argnames=("tm_cap",))
def conv2d_forward(x, weight, bias, *, tm_cap=256):
    """Pallas equivalent of Conv2D.forward: corr2d(x, weight) + bias."""
    x = jnp.asarray(x, jnp.float32)
    weight = jnp.asarray(weight, jnp.float32)
    bias = jnp.asarray(bias, jnp.float32).reshape((1,))

    h, w = x.shape
    kh, kw = weight.shape
    oh, ow = h - kh + 1, w - kw + 1

    # Lane-dense padded output width (multiple of 128) -> unmasked vector stores.
    w_pad = _round_up(max(w, 128), 128)
    # Row-tile size: multiple of 8, capped so (2x input tile + 2x output tile)
    # stays well inside the 32 MiB scoped-VMEM budget on every generation.
    tm = min(tm_cap, _round_up(oh, 8))
    oh_pad = _round_up(oh, tm)
    h_pad = oh_pad + kh - 1
    n_tiles = oh_pad // tm

    x_p = jnp.pad(x, ((0, h_pad - h), (0, w_pad - w)))

    kernel = _make_corr2d_kernel(tm, kh, kw, w_pad)

    out_p = pl.pallas_call(
        kernel,
        out_shape=jax.ShapeDtypeStruct((oh_pad, w_pad), jnp.float32),
        grid_spec=pltpu.PrefetchScalarGridSpec(
            num_scalar_prefetch=0,
            grid=(n_tiles,),
            in_specs=[
                pl.BlockSpec(memory_space=pl.ANY),                   # X stays in HBM
                pl.BlockSpec(memory_space=pltpu.MemorySpace.SMEM),   # weight (scalar taps)
                pl.BlockSpec(memory_space=pltpu.MemorySpace.SMEM),   # bias scalar
            ],
            out_specs=pl.BlockSpec((tm, w_pad), lambda t: (t, 0)),
            scratch_shapes=[
                pltpu.VMEM((2, tm + kh - 1, w_pad), jnp.float32),    # double-buffered rows
                pltpu.SemaphoreType.DMA((2,)),
            ],
        ),
        compiler_params=pltpu.CompilerParams(
            # Cross-step double-buffer state (prologue at t==0, prefetch of t+1)
            # requires sequential execution of the row axis.
            dimension_semantics=("arbitrary",),
            vmem_limit_bytes=32 * 1024 * 1024,
        ),
    )(x_p, weight, bias)

    return out_p[:oh, :ow]


def _corr2d_ref(x, k, b):
    """Pure-JAX reference (same semantics as the PyTorch corr2d loop)."""
    kh, kw = k.shape
    oh, ow = x.shape[0] - kh + 1, x.shape[1] - kw + 1
    out = jnp.zeros((oh, ow), jnp.float32)
    for i in range(kh):
        for j in range(kw):
            out = out + x[i:i + oh, j:j + ow] * k[i, j]
    return out + b[0]


if __name__ == "__main__":
    key = jax.random.PRNGKey(0)
    k_x, k_w, k_b, k_x2 = jax.random.split(key, 4)

    KH, KW = 3, 3
    weight = jax.random.normal(k_w, (KH, KW), dtype=jnp.float32)  # nn.Parameter(randn(kernel_size))
    bias = jax.random.normal(k_b, (1,), dtype=jnp.float32)        # nn.Parameter(randn(1))

    # Small case consistent with the module (single 2D image, (3,3) kernel).
    H, W = 16, 16
    x = jax.random.normal(k_x, (H, W), dtype=jnp.float32)
    y = jax.block_until_ready(conv2d_forward(x, weight, bias))
    y_ref = _corr2d_ref(x, weight, bias)
    assert y.shape == (H - KH + 1, W - KW + 1)
    assert jnp.allclose(y, y_ref, atol=1e-5, rtol=1e-5)

    # Larger case exercising the row-tiled grid + double-buffered halo DMA path.
    H2, W2 = 300, 200
    x2 = jax.random.normal(k_x2, (H2, W2), dtype=jnp.float32)
    y2 = jax.block_until_ready(conv2d_forward(x2, weight, bias))
    y2_ref = _corr2d_ref(x2, weight, bias)
    assert y2.shape == (H2 - KH + 1, W2 - KW + 1)
    assert jnp.allclose(y2, y2_ref, atol=1e-4, rtol=1e-4)

    print("KERNEL_OK")
</pallas_src>

<mosaic_0001>
module attributes {stable_mosaic.version = 11 : i64} {
  func.func @kernel(%arg0: i32, %arg1: memref<18x128xf32, #tpu.memory_space<any>>, %arg2: memref<3x3xf32, #tpu.memory_space<smem>>, %arg3: memref<1xf32, #tpu.memory_space<smem>>, %arg4: memref<16x128xf32, #tpu.memory_space<vmem>>, %arg5: memref<2x18x128xf32, #tpu.memory_space<vmem>>, %arg6: memref<2x!tpu.dma_semaphore, #tpu.memory_space<semaphore_mem>>) attributes {dimension_semantics = [#tpu.dimension_semantics<arbitrary>], iteration_bounds = array<i64: 1>, scalar_prefetch = 0 : i64, scratch_operands = 2 : i64, tpu.core_type = #tpu.core_type<tc>, window_params = [{}, {transform_indices = @transform_1, window_bounds = array<i64: 3, 3>}, {transform_indices = @transform_2, window_bounds = array<i64: 1>}, {transform_indices = @transform_3, window_bounds = array<i64: 16, 128>}]} {
    %c1_i32 = arith.constant 1 : i32
    %0 = arith.andi %arg0, %c1_i32 : i32
    %c0_i32 = arith.constant 0 : i32
    %1 = arith.cmpi eq, %arg0, %c0_i32 : i32
    %2 = arith.extui %1 : i1 to i32
    %c0_i32_0 = arith.constant 0 : i32
    %3 = arith.cmpi ne, %2, %c0_i32_0 : i32
    scf.if %3 {
      %c16_i32 = arith.constant 16 : i32
      %64 = arith.muli %arg0, %c16_i32 : i32
      %65 = tpu.assume_multiple %64, 8 : i32
      %c0_i32_32 = arith.constant 0 : i32
      %66 = tpu.memref_slice %arg1[%65, %c0_i32_32] : memref<18x128xf32, #tpu.memory_space<any>> -> memref<18x128xf32, #tpu.memory_space<any>>
      %c0_i32_33 = arith.constant 0 : i32
      %c0_i32_34 = arith.constant 0 : i32
      %67 = tpu.memref_slice %arg5[%0, %c0_i32_33, %c0_i32_34] : memref<2x18x128xf32, #tpu.memory_space<vmem>> -> memref<1x18x128xf32, #tpu.memory_space<vmem>>
      %68 = tpu.memref_squeeze %67 : memref<1x18x128xf32, #tpu.memory_space<vmem>> -> memref<18x128xf32, #tpu.memory_space<vmem>>
      %69 = tpu.memref_slice %arg6[%0] : memref<2x!tpu.dma_semaphore, #tpu.memory_space<semaphore_mem>> -> memref<1x!tpu.dma_semaphore, #tpu.memory_space<semaphore_mem>>
      %70 = tpu.memref_squeeze %69 : memref<1x!tpu.dma_semaphore, #tpu.memory_space<semaphore_mem>> -> memref<!tpu.dma_semaphore, #tpu.memory_space<semaphore_mem>>
      tpu.enqueue_dma source(%66 : memref<18x128xf32, #tpu.memory_space<any>>) target(%68 : memref<18x128xf32, #tpu.memory_space<vmem>>) target_semaphore(%70 : memref<!tpu.dma_semaphore, #tpu.memory_space<semaphore_mem>>)
    } else {
    }
    %c0_i32_1 = arith.constant 0 : i32
    %c0_i32_2 = arith.constant 0 : i32
    %4 = tpu.memref_slice %arg1[%c0_i32_1, %c0_i32_2] : memref<18x128xf32, #tpu.memory_space<any>> -> memref<18x128xf32, #tpu.memory_space<any>>
    %c0_i32_3 = arith.constant 0 : i32
    %c0_i32_4 = arith.constant 0 : i32
    %5 = tpu.memref_slice %arg5[%0, %c0_i32_3, %c0_i32_4] : memref<2x18x128xf32, #tpu.memory_space<vmem>> -> memref<1x18x128xf32, #tpu.memory_space<vmem>>
    %6 = tpu.memref_squeeze %5 : memref<1x18x128xf32, #tpu.memory_space<vmem>> -> memref<18x128xf32, #tpu.memory_space<vmem>>
    %7 = tpu.memref_slice %arg6[%0] : memref<2x!tpu.dma_semaphore, #tpu.memory_space<semaphore_mem>> -> memref<1x!tpu.dma_semaphore, #tpu.memory_space<semaphore_mem>>
    %8 = tpu.memref_squeeze %7 : memref<1x!tpu.dma_semaphore, #tpu.memory_space<semaphore_mem>> -> memref<!tpu.dma_semaphore, #tpu.memory_space<semaphore_mem>>
    tpu.wait_dma2 semaphore(%8 : memref<!tpu.dma_semaphore, #tpu.memory_space<semaphore_mem>>) src(%4 : memref<18x128xf32, #tpu.memory_space<any>>) dst(%6 : memref<18x128xf32, #tpu.memory_space<vmem>>)
    %c1_i32_5 = arith.constant 1 : i32
    %9 = arith.addi %arg0, %c1_i32_5 : i32
    %c1_i32_6 = arith.constant 1 : i32
    %10 = arith.cmpi slt, %9, %c1_i32_6 : i32
    %11 = arith.extui %10 : i1 to i32
    %c0_i32_7 = arith.constant 0 : i32
    %12 = arith.cmpi ne, %11, %c0_i32_7 : i32
    scf.if %12 {
      %c1_i32_32 = arith.constant 1 : i32
      %64 = arith.addi %arg0, %c1_i32_32 : i32
      %c1_i32_33 = arith.constant 1 : i32
      %65 = arith.subi %c1_i32_33, %0 : i32
      %c16_i32 = arith.constant 16 : i32
      %66 = arith.muli %64, %c16_i32 : i32
      %67 = tpu.assume_multiple %66, 8 : i32
      %c0_i32_34 = arith.constant 0 : i32
      %68 = tpu.memref_slice %arg1[%67, %c0_i32_34] : memref<18x128xf32, #tpu.memory_space<any>> -> memref<18x128xf32, #tpu.memory_space<any>>
      %c0_i32_35 = arith.constant 0 : i32
      %c0_i32_36 = arith.constant 0 : i32
      %69 = tpu.memref_slice %arg5[%65, %c0_i32_35, %c0_i32_36] : memref<2x18x128xf32, #tpu.memory_space<vmem>> -> memref<1x18x128xf32, #tpu.memory_space<vmem>>
      %70 = tpu.memref_squeeze %69 : memref<1x18x128xf32, #tpu.memory_space<vmem>> -> memref<18x128xf32, #tpu.memory_space<vmem>>
      %71 = tpu.memref_slice %arg6[%65] : memref<2x!tpu.dma_semaphore, #tpu.memory_space<semaphore_mem>> -> memref<1x!tpu.dma_semaphore, #tpu.memory_space<semaphore_mem>>
      %72 = tpu.memref_squeeze %71 : memref<1x!tpu.dma_semaphore, #tpu.memory_space<semaphore_mem>> -> memref<!tpu.dma_semaphore, #tpu.memory_space<semaphore_mem>>
      tpu.enqueue_dma source(%68 : memref<18x128xf32, #tpu.memory_space<any>>) target(%70 : memref<18x128xf32, #tpu.memory_space<vmem>>) target_semaphore(%72 : memref<!tpu.dma_semaphore, #tpu.memory_space<semaphore_mem>>)
    } else {
    }
    %13 = arith.index_cast %0 : i32 to index
    %c0 = arith.constant 0 : index
    %c0_8 = arith.constant 0 : index
    %14 = vector.load %arg5[%13, %c0, %c0_8] : memref<2x18x128xf32, #tpu.memory_space<vmem>>, vector<1x18x128xf32>
    %15 = vector.shape_cast %14 : vector<1x18x128xf32> to vector<18x128xf32>
    %c0_9 = arith.constant 0 : index
    %16 = memref.load %arg3[%c0_9] : memref<1xf32, #tpu.memory_space<smem>>
    %17 = vector.broadcast %16 : f32 to vector<16x128xf32>
    %18 = vector.extract_strided_slice %15 {offsets = [0, 0], sizes = [16, 128], strides = [1, 1]} : vector<18x128xf32> to vector<16x128xf32>
    %c0_10 = arith.constant 0 : index
    %c0_11 = arith.constant 0 : index
    %19 = memref.load %arg2[%c0_10, %c0_11] : memref<3x3xf32, #tpu.memory_space<smem>>
    %20 = vector.broadcast %19 : f32 to vector<16x128xf32>
    %21 = arith.mulf %18, %20 : vector<16x128xf32>
    %22 = arith.addf %17, %21 : vector<16x128xf32>
    %c127_i32 = arith.constant 127 : i32
    %23 = tpu.dynamic_rotate %18 by %c127_i32 dim 1 : vector<16x128xf32>, i32 -> vector<16x128xf32>
    %c0_12 = arith.constant 0 : index
    %c1 = arith.constant 1 : index
    %24 = memref.load %arg2[%c0_12, %c1] : memref<3x3xf32, #tpu.memory_space<smem>>
    %25 = vector.broadcast %24 : f32 to vector<16x128xf32>
    %26 = arith.mulf %23, %25 : vector<16x128xf32>
    %27 = arith.addf %22, %26 : vector<16x128xf32>
    %c126_i32 = arith.constant 126 : i32
    %28 = tpu.dynamic_rotate %18 by %c126_i32 dim 1 : vector<16x128xf32>, i32 -> vector<16x128xf32>
    %c0_13 = arith.constant 0 : index
    %c2 = arith.constant 2 : index
    %29 = memref.load %arg2[%c0_13, %c2] : memref<3x3xf32, #tpu.memory_space<smem>>
    %30 = vector.broadcast %29 : f32 to vector<16x128xf32>
    %31 = arith.mulf %28, %30 : vector<16x128xf32>
    %32 = arith.addf %27, %31 : vector<16x128xf32>
    %33 = vector.extract_strided_slice %15 {offsets = [1, 0], sizes = [16, 128], strides = [1, 1]} : vector<18x128xf32> to vector<16x128xf32>
    %c1_14 = arith.constant 1 : index
    %c0_15 = arith.constant 0 : index
    %34 = memref.load %arg2[%c1_14, %c0_15] : memref<3x3xf32, #tpu.memory_space<smem>>
    %35 = vector.broadcast %34 : f32 to vector<16x128xf32>
    %36 = arith.mulf %33, %35 : vector<16x128xf32>
    %37 = arith.addf %32, %36 : vector<16x128xf32>
    %c127_i32_16 = arith.constant 127 : i32
    %38 = tpu.dynamic_rotate %33 by %c127_i32_16 dim 1 : vector<16x128xf32>, i32 -> vector<16x128xf32>
    %c1_17 = arith.constant 1 : index
    %c1_18 = arith.constant 1 : index
    %39 = memref.load %arg2[%c1_17, %c1_18] : memref<3x3xf32, #tpu.memory_space<smem>>
    %40 = vector.broadcast %39 : f32 to vector<16x128xf32>
    %41 = arith.mulf %38, %40 : vector<16x128xf32>
    %42 = arith.addf %37, %41 : vector<16x128xf32>
    %c126_i32_19 = arith.constant 126 : i32
    %43 = tpu.dynamic_rotate %33 by %c126_i32_19 dim 1 : vector<16x128xf32>, i32 -> vector<16x128xf32>
    %c1_20 = arith.constant 1 : index
    %c2_21 = arith.constant 2 : index
    %44 = memref.load %arg2[%c1_20, %c2_21] : memref<3x3xf32, #tpu.memory_space<smem>>
    %45 = vector.broadcast %44 : f32 to vector<16x128xf32>
    %46 = arith.mulf %43, %45 : vector<16x128xf32>
    %47 = arith.addf %42, %46 : vector<16x128xf32>
    %48 = vector.extract_strided_slice %15 {offsets = [2, 0], sizes = [16, 128], strides = [1, 1]} : vector<18x128xf32> to vector<16x128xf32>
    %c2_22 = arith.constant 2 : index
    %c0_23 = arith.constant 0 : index
    %49 = memref.load %arg2[%c2_22, %c0_23] : memref<3x3xf32, #tpu.memory_space<smem>>
    %50 = vector.broadcast %49 : f32 to vector<16x128xf32>
    %51 = arith.mulf %48, %50 : vector<16x128xf32>
    %52 = arith.addf %47, %51 : vector<16x128xf32>
    %c127_i32_24 = arith.constant 127 : i32
    %53 = tpu.dynamic_rotate %48 by %c127_i32_24 dim 1 : vector<16x128xf32>, i32 -> vector<16x128xf32>
    %c2_25 = arith.constant 2 : index
    %c1_26 = arith.constant 1 : index
    %54 = memref.load %arg2[%c2_25, %c1_26] : memref<3x3xf32, #tpu.memory_space<smem>>
    %55 = vector.broadcast %54 : f32 to vector<16x128xf32>
    %56 = arith.mulf %53, %55 : vector<16x128xf32>
    %57 = arith.addf %52, %56 : vector<16x128xf32>
    %c126_i32_27 = arith.constant 126 : i32
    %58 = tpu.dynamic_rotate %48 by %c126_i32_27 dim 1 : vector<16x128xf32>, i32 -> vector<16x128xf32>
    %c2_28 = arith.constant 2 : index
    %c2_29 = arith.constant 2 : index
    %59 = memref.load %arg2[%c2_28, %c2_29] : memref<3x3xf32, #tpu.memory_space<smem>>
    %60 = vector.broadcast %59 : f32 to vector<16x128xf32>
    %61 = arith.mulf %58, %60 : vector<16x128xf32>
    %62 = arith.addf %57, %61 : vector<16x128xf32>
    %c0_30 = arith.constant 0 : index
    %c0_31 = arith.constant 0 : index
    %63 = vector.load %arg4[%c0_30, %c0_31] : memref<16x128xf32, #tpu.memory_space<vmem>>, vector<16x128xf32>
    tpu.vector_store %arg4[%c0_30, %c0_31], %62 {strides = array<i32>} : memref<16x128xf32, #tpu.memory_space<vmem>>, vector<16x128xf32>,
    return
  }
  func.func @transform_1(%arg0: i32) -> (i32, i32) {
    %c0_i32 = arith.constant 0 : i32
    %c0_i32_0 = arith.constant 0 : i32
    %c0_i32_1 = arith.constant 0 : i32
    return %c0_i32, %c0_i32_0 : i32, i32
  }
  func.func @transform_2(%arg0: i32) -> i32 {
    %c0_i32 = arith.constant 0 : i32
    %c0_i32_0 = arith.constant 0 : i32
    return %c0_i32 : i32
  }
  func.func @transform_3(%arg0: i32) -> (i32, i32) {
    %c0_i32 = arith.constant 0 : i32
    %c0_i32_0 = arith.constant 0 : i32
    return %arg0, %c0_i32 : i32, i32
  }
}

</mosaic_0001>

<bundles_post_ra>
// kernel: conv2d_forward.1
= control target key start
LH: loop header
LB: loop body
LE: loop exit
PB: predicated region body
PF: predicated region fallthrough
CT: control target
= control target key end

     0   :  { %9 = vsyncpa [#allocation7], 0  ;;  %s496_s0 = inlined_call_operand.vmem [shape: f32[18,128], index: 0, kind: input, shape index: {}]   ;;  %s497_s1 = inlined_call_operand.vmem [shape: f32[3,3], index: 1, kind: input, shape index: {}]   ;;  %s498_s2 = inlined_call_operand.<no memory space> [shape: f32[1], index: 2, kind: input, shape index: {}]   ;;  %s499_s3 = inlined_call_operand.hbm [shape: f32[16,128], index: 3, kind: output, shape index: {}]  }
   0x1   :  { %10 = vsyncpa [#allocation6], 0  ;;  %s17_s14 = sshll.u32 %s497_s1, 4  ;;  %s18_s14 = int_to_ptr.vmem [resolvable:$true] %s17_s14 }
   0x2   :  { %s383_s15 = scalar_lea.vmem %s18_s14, 64  ;;  %p388_p1 = scmp.lt.s32.totalorder %s18_s14, %s18_s14 }
   0x3   :  { %p384_p0 = scmp.ne.s32.totalorder %s18_s14, %s383_s15  ;;  %p389_p2 = scmp.lt.s32.totalorder %s383_s15, %s383_s15 }
   0x5   :  { %p390_p3 = por %p389_p2, %p388_p1 }
   0x7   :  { %p391_p4 = pnand %p390_p3, %p384_p0 }
   0x9   :  { %394 = shalt.err (!%p391_p4)
}
   0xa   :  { %s423_s16 = smov [#allocation5]  }
   0xb   :  { %20 = dma.vmem_to_smem %s18_s14, 64, %s423_s16, [#allocation7]  }
   0xc   :  { %417 = dma.done.wait [#allocation7], 64  }
   0xd   :  { %418 = vsyncadd [#allocation7], 4294967232 }
   0xe   :  { %26 = sfence }
   0xf   :  { %v74_v0 = vld [vmem:[%s496_s0] sm:$0xff]  ;;  %v76_v1 = vld [vmem:[%s496_s0 + $0x8] sm:$0xff]  ;;  %v361_v2 = vld [vmem:[%s496_s0 + $0x10] sm:$0x3] }
  0x10   :  { %75 = vst [vmem:[#allocation2] sm:$0xff] %v74_v0  ;;  %77 = vst [vmem:[#allocation2 + $0x8] sm:$0xff] %v76_v1 }
  0x11   :  { %88 = vst [vmem:[#allocation2 + $0x10] sm:$0x3] %v361_v2 }
  0x12   :  { %92 = vsyncadd [#allocation3], 288 }
  0x13   :  { %419 = dma.done.wait [#allocation3], 288 }
  0x14   :  { %420 = vsyncadd [#allocation3], 4294967008  ;;  %s369_s22 = sld [smem:[#allocation5 + $0x80]]  ;;  %s424_s24 = smov 126   ;;  %vm205_vm0 = vcmask 1046528   ;;  %vm253_vm1 = vcmask 1045504   ;;  %v170_v36 = vstv %s498_s2 }
  0x15   :  { %s372_s23 = sld [smem:[#allocation5 + $0x100]]  ;;  %s425_s25 = smov 127  }
  0x16   :  { %s171_s0 = sld [smem:[#allocation5]]  ;;  %s367_s26 = sld [smem:[#allocation5 + $0x1]] }
  0x17   :  { %v166_v3 = vld [vmem:[#allocation2] sm:$0xff]  ;;  %v167_v4 = vld [vmem:[#allocation2 + $0x8] sm:$0xff]  ;;  %s368_s27 = sld [smem:[#allocation5 + $0x2]]  ;;  %s370_s30 = sld [smem:[#allocation5 + $0x81]] }
  0x18   :  { %v168_v5 = vld [vmem:[#allocation2 + $0x10] sm:$0x3]  ;;  %187 = vrot.lane.b32.xlu1 %v166_v3, %s424_s24  ;;  %177 = vrot.lane.b32.xlu0 %v166_v3, %s425_s25  ;;  %v219_v6 = vrot.slane %v167_v4, 1  ;;  %v218_v8 = vrot.slane %v166_v3, 1  ;;  %v264_v26 = vrot.slane %v167_v4, 2  ;;  %v263_v28 = vrot.slane %v166_v3, 2 }
  0x19   :  { %v221_v7 = vrot.slane %v168_v5, 1  ;;  %v266_v27 = vrot.slane %v168_v5, 2  ;;  %s371_s4 = sld [smem:[#allocation5 + $0x82]]  ;;  %s373_s5 = sld [smem:[#allocation5 + $0x101]] }
  0x1a   :  { %v198_v9 = vstv %s369_s22  ;;  %v220_v14 = vsel %vm205_vm0, %v218_v8, %v219_v6  ;;  %v265_v33 = vsel %vm253_vm1, %v263_v28, %v264_v26  ;;  %s374_s2 = sld [smem:[#allocation5 + $0x102]]  ;;  %s426_s6 = smov [#allocation8]  }
  0x1b   :  { %v200_v10 = vmul.f32 %v198_v9, %v167_v4  ;;  %v201_v11 = vmul.f32 %v198_v9, %v168_v5  ;;  %v199_v12 = vmul.f32 %v198_v9, %v166_v3  ;;  %v222_v13 = vsel %vm205_vm0, %v219_v6, %v221_v7  ;;  %s297_s7 = sshll.u32 %s426_s6, 4  ;;  %s298_s7 = int_to_ptr.vmem [resolvable:$true] %s297_s7 }
  0x1c   :  { %189 = vrot.lane.b32.xlu1 %v167_v4, %s424_s24  ;;  %179 = vrot.lane.b32.xlu0 %v167_v4, %s425_s25  ;;  %v246_v16 = vstv %s372_s23  ;;  %v267_v32 = vsel %vm253_vm1, %v264_v26, %v266_v27  ;;  %v172_v34 = vstv %s171_s0  ;;  %s395_s8 = scalar_lea.vmem %s298_s7, 256  ;;  %p400_p6 = scmp.lt.s32.totalorder %s298_s7, %s298_s7 }
  0x1d   :  { %v207_v15 = vrot.slane %v200_v10, 1  ;;  %v209_v17 = vrot.slane %v201_v11, 1  ;;  %v206_v18 = vrot.slane %v199_v12, 1  ;;  %v248_v19 = vmul.f32 %v246_v16, %v167_v4  ;;  %p396_p5 = scmp.ne.s32.totalorder %s298_s7, %s395_s8  ;;  %p401_p7 = scmp.lt.s32.totalorder %s395_s8, %s395_s8 }
  0x1e   :  { %v249_v20 = vmul.f32 %v246_v16, %v168_v5  ;;  %v247_v21 = vmul.f32 %v246_v16, %v166_v3  ;;  %v173_v35 = vmul.f32 %v172_v34, %v166_v3  ;;  %v182_v37 = vstv %s367_s26 }
  0x1f   :  { %v210_v22 = vsel %vm205_vm0, %v207_v15, %v209_v17  ;;  %v208_v23 = vsel %vm205_vm0, %v206_v18, %v207_v15  ;;  %v255_v24 = vrot.slane %v248_v19, 2  ;;  %v174_v39 = vmul.f32 %v172_v34, %v167_v4  ;;  %p402_p8 = por %p401_p7, %p400_p6 }
  0x20   :  { %227 = vrot.lane.b32.xlu1 %v222_v13, %s425_s25  ;;  %225 = vrot.lane.b32.xlu0 %v220_v14, %s425_s25  ;;  %v257_v25 = vrot.slane %v249_v20, 2  ;;  %v254_v29 = vrot.slane %v247_v21, 2  ;;  %v175_v38 = vadd.f32 %v173_v35, %v170_v36  ;;  %v192_v40 = vstv %s368_s27 }
  0x21   :  { %v176_v46 = vadd.f32 %v174_v39, %v170_v36  ;;  %v230_v51 = vstv %s370_s30  ;;  %v240_v59 = vstv %s371_s4  ;;  %v275_v4 = vstv %s373_s5  ;;  %p403_p9 = pnand %p402_p8, %p396_p5 }
  0x22   :  { %v258_v30 = vsel %vm253_vm1, %v255_v24, %v257_v25  ;;  %v256_v31 = vsel %vm253_vm1, %v254_v29, %v255_v24 }
  0x24   :  { %237 = vrot.lane.b32.xlu1 %v222_v13, %s424_s24  ;;  %235 = vrot.lane.b32.xlu0 %v220_v14, %s424_s24  ;;  %v285_v13 = vstv %s374_s2 }
  0x28   :  { %272 = vrot.lane.b32.xlu1 %v267_v32, %s425_s25  ;;  %270 = vrot.lane.b32.xlu0 %v265_v33, %s425_s25 }
  0x2c   :  { %282 = vrot.lane.b32.xlu1 %v267_v32, %s424_s24  ;;  %280 = vrot.lane.b32.xlu0 %v265_v33, %s424_s24 }
  0x8a   :  { %v188_v41 = vpop.permute.xlu1 %187  ;;  %v178_v42 = vpop.permute.xlu0 %177 }
  0x8b   :  { %v183_v43 = vmul.f32 %v182_v37, %v178_v42  ;;  %v193_v44 = vmul.f32 %v192_v40, %v188_v41 }
  0x8d   :  { %v185_v45 = vadd.f32 %v183_v43, %v175_v38 }
  0x8e   :  { %v190_v47 = vpop.permute.xlu1 %189  ;;  %v180_v48 = vpop.permute.xlu0 %179 }
  0x8f   :  { %v195_v49 = vadd.f32 %v193_v44, %v185_v45  ;;  %v184_v50 = vmul.f32 %v182_v37, %v180_v48  ;;  %v194_v52 = vmul.f32 %v192_v40, %v190_v47 }
  0x91   :  { %v186_v53 = vadd.f32 %v184_v50, %v176_v46  ;;  %v213_v54 = vadd.f32 %v208_v23, %v195_v49 }
  0x92   :  { %v228_v55 = vpop.permute.xlu1 %227  ;;  %v226_v56 = vpop.permute.xlu0 %225 }
  0x93   :  { %v196_v57 = vadd.f32 %v194_v52, %v186_v53  ;;  %v231_v58 = vmul.f32 %v230_v51, %v226_v56  ;;  %v232_v61 = vmul.f32 %v230_v51, %v228_v55 }
  0x95   :  { %v214_v60 = vadd.f32 %v210_v22, %v196_v57  ;;  %v233_v1 = vadd.f32 %v231_v58, %v213_v54 }
  0x96   :  { %v238_v62 = vpop.permute.xlu1 %237  ;;  %v236_v63 = vpop.permute.xlu0 %235 }
  0x97   :  { %v234_v0 = vadd.f32 %v232_v61, %v214_v60  ;;  %v242_v2 = vmul.f32 %v240_v59, %v238_v62  ;;  %v241_v3 = vmul.f32 %v240_v59, %v236_v63 }
  0x99   :  { %v244_v5 = vadd.f32 %v242_v2, %v234_v0  ;;  %v243_v6 = vadd.f32 %v241_v3, %v233_v1 }
  0x9a   :  { %v273_v7 = vpop.permute.xlu1 %272  ;;  %v271_v8 = vpop.permute.xlu0 %270 }
  0x9b   :  { %v262_v9 = vadd.f32 %v258_v30, %v244_v5  ;;  %v277_v10 = vmul.f32 %v275_v4, %v273_v7  ;;  %v261_v11 = vadd.f32 %v256_v31, %v243_v6  ;;  %v276_v12 = vmul.f32 %v275_v4, %v271_v8 }
  0x9d   :  { %v279_v16 = vadd.f32 %v277_v10, %v262_v9  ;;  %v278_v17 = vadd.f32 %v276_v12, %v261_v11 }
  0x9e   :  { %v283_v14 = vpop.permute.xlu1 %282  ;;  %v281_v15 = vpop.permute.xlu0 %280 }
  0x9f   :  { %v287_v18 = vmul.f32 %v285_v13, %v283_v14  ;;  %v286_v19 = vmul.f32 %v285_v13, %v281_v15 }
  0xa1   :  { %v289_v20 = vadd.f32 %v287_v18, %v279_v16  ;;  %v288_v21 = vadd.f32 %v286_v19, %v278_v17 }
  0xa3   :  { %291 = vst [vmem:[#allocation8 + $0x8] sm:$0xff] %v289_v20  ;;  %290 = vst [vmem:[#allocation8] sm:$0xff] %v288_v21 }
  0xa4   :  { %406 = shalt.err (!%p403_p9)
}
  0xa5   :  { %s407_s11 = scalar_lea.hbm %s499_s3, 256 }
  0xa6   :  { %p408_p10 = scmp.ne.s32.totalorder %s499_s3, %s407_s11  ;;  %p411_p11 = scmp.lt.u32.totalorder %s407_s11, %s499_s3 }
  0xa8   :  { %p413_p12 = pnand %p411_p11, %p408_p10 }
  0xaa   :  { %416 = shalt.err (!%p413_p12)
}
  0xab   :  { %s427_s16 = smov 128   ;;  %s428_s17 = smov 8  }
  0xac   :  { %303 = dma.vmem_to_hbm [thread:$0]  %s298_s7, 256, %s499_s3, [#allocation6], %s427_s16, %s427_s16, %s428_s17  }
  0xad   :  { %421 = dma.done.wait [#allocation6], 256  }
  0xae   :  { %422 = vsyncadd [#allocation6], 4294967040 }
  0xaf   :  { %307 = vsyncpa [#allocation6], 1 }
  0xb0   :  { %308 = vsyncpa [#allocation7], 1 }
  0xb1   :  { %309 = vsyncmov [#allocation3] }
  0xb4   :  { %s310_s20 = vpop.sfrf %309 }
  0xb5   :  { %p375_p13 = scmp.ne.s32.totalorder %s310_s20, 0 }
  0xb7   :  { %314 = shalt.err (%p375_p13)  }
  0xb8   :  { %316 = vsyncmov [#allocation3 + $0x1] }
  0xbb   :  { %s317_s1 = vpop.sfrf %316 }
  0xbc   :  { %p376_p0 = scmp.ne.s32.totalorder %s317_s1, 0 }
  0xbe   :  { %321 = shalt.err (%p376_p0)  }

</bundles_post_ra>
